<compile_context>
chip_gen: v7x
topology: tpu7x:2x2x1
jax: 0.10.0
libtpu: 0.0.40
codegen_flags: <defaults>
</compile_context>

<pallas_src>
import functools

import jax
import jax.numpy as jnp
import numpy as np
from jax import lax
from jax.experimental import pallas as pl
from jax.experimental.pallas import tpu as pltpu

EPS = 1e-5          # PyTorch BatchNorm2d default eps
CPAD = 128          # channel / K axis padded to one full lane register (lane-dense)
OUT_CH = 21         # final channel count of the backbone

# Static per-block config: (conv1_idx, conv2_idx, stride, shortcut_1x1_idx or None)
# Block order: b1_0, b1_1, b2_0, b2_1, b3_0, b3_1.
_BLOCKS = (
    (0, 1, 1, None),
    (2, 3, 1, None),
    (4, 5, 2, 0),
    (6, 7, 1, None),
    (8, 9, 2, 1),
    (10, 11, 1, None),
)
# Input-channel count of every 3x3 conv, in packed-weight order.
_CIN = (3, 3, 3, 3, 3, 12, 12, 12, 12, 21, 21, 21)


def _round_up(x, m):
    return ((x + m - 1) // m) * m


def _taps_per_group(cin):
    # All 9 taps fit in one 128-lane K group when 9*cin <= 128, else split 6 + 3.
    return 9 if 9 * cin <= CPAD else 6


@functools.lru_cache(maxsize=1)
def _roll_moves_lanes_up():
    """True if pltpu.roll with positive shift moves lane i -> lane i+shift (np.roll).

    The packed weight row layout must match the hardware lane-rotate direction; probe it
    once with a tiny kernel instead of hard-coding an assumption.
    """
    def k(x_ref, o_ref):
        o_ref[...] = pltpu.roll(x_ref[...], shift=1, axis=1)

    x = jnp.zeros((8, CPAD), jnp.float32).at[:, 0].set(1.0)
    y = pl.pallas_call(k, out_shape=jax.ShapeDtypeStruct((8, CPAD), jnp.float32))(x)
    return bool(np.asarray(y)[0, 1] > 0.5)


# ----------------------------------------------------------------------------
# In-kernel helpers (flat (rows, 128) activations, whole batch merged)
# ----------------------------------------------------------------------------
def _edge_masks(n, h, w):
    """Per-row validity masks for the four conv-tap directions (merged-batch layout).

    Rows are image-major (n images of h*w rows each); hh = (row // w) % h also masks the
    seams between concatenated images.  Computed once per resolution (review: hoist the
    iota/div/mod out of the per-conv loop).
    """
    m = n * h * w
    row = lax.broadcasted_iota(jnp.int32, (m, CPAD), 0)
    hh = (row // w) % h
    ww = row % w
    return (hh >= 1, hh <= h - 2, ww >= 1, ww <= w - 2)


def _conv3x3(x, m, w, cin, idx, w33_ref, s33_ref, b33_ref, buf_ref, masks, pad, sub=None):
    """3x3 / pad-1 conv of a flat (m, 128) activation, with eval-BN scale/shift applied.

    The 9 shifted tap views are lane-packed into the K axis with pltpu.roll, so the conv
    is a single (m,128)x(128,128) MXU matmul (two when 9*cin > 128).  If `sub` is given
    (stride-2 block), the packed im2col matrix is subsampled BEFORE the weight matmul so
    the weight matmul runs on m/4 rows.
    """
    buf_ref[pad:pad + m, :] = x
    mtop, mbot, mleft, mright = masks
    tpg = _taps_per_group(cin)
    ngroups = 1 if tpg == 9 else 2

    packed = [None] * ngroups
    for t in range(9):
        dy, dx = t // 3, t % 3
        off = (dy - 1) * w + (dx - 1)
        a = buf_ref[pad + off:pad + off + m, :]
        conds = []
        if dy == 0:
            conds.append(mtop)
        if dy == 2:
            conds.append(mbot)
        if dx == 0:
            conds.append(mleft)
        if dx == 2:
            conds.append(mright)
        if conds:
            msk = conds[0]
            for c in conds[1:]:
                msk = jnp.logical_and(msk, c)
            a = jnp.where(msk, a, 0.0)
        g, tg = (0, t) if t < tpg else (1, t - tpg)
        if tg:                                          # lane-pack tap tg at offset tg*cin
            a = pltpu.roll(a, shift=tg * cin, axis=1)
        packed[g] = a if packed[g] is None else packed[g] + a

    out = None
    for g in range(ngroups):
        p = packed[g]
        if sub is not None:                             # stride-2: subsample pre-matmul
            p = jnp.dot(sub, p, preferred_element_type=jnp.float32)
        y = jnp.dot(p, w33_ref[idx, g, :, :].astype(jnp.float32),
                    preferred_element_type=jnp.float32)
        out = y if out is None else out + y
    # Eval-mode BatchNorm: per-channel scale + shift (conv bias folded into the shift).
    return out * s33_ref[idx, :, :] + b33_ref[idx, :, :]


def _backbone_kernel(x_ref, w33_ref, s33_ref, b33_ref, w11_ref, b11_ref,
                     sub2_ref, sub3_ref, o_ref, buf_ref, *, n, h0, w0, pad):
    m1 = n * h0 * w0
    # Zero the shift-buffer halo once: every later buf_ref read sees either freshly
    # written activations or this zeroed halo, never uninitialized VMEM.
    buf_ref[0:pad, :] = jnp.zeros((pad, CPAD), jnp.float32)
    buf_ref[pad + m1:m1 + 2 * pad, :] = jnp.zeros((pad, CPAD), jnp.float32)

    x = x_ref[...]                           # (n*h0*w0, 128), channels in lanes [0, 3)
    h, w, m = h0, w0, m1
    masks = _edge_masks(n, h, w)             # hoisted; rebuilt only when (h, w) shrink
    for c1, c2, stride, sc in _BLOCKS:
        if stride == 2:
            sub = (sub2_ref if h == h0 else sub3_ref)[...].astype(jnp.float32)
        else:
            sub = None

        # --- shortcut branch ---
        if sc is not None:                   # 1x1 conv, stride 2, no BN
            xd = jnp.dot(sub, x, preferred_element_type=jnp.float32)
            skip = jnp.dot(xd, w11_ref[sc, :, :].astype(jnp.float32),
                           preferred_element_type=jnp.float32) + b11_ref[sc, :, :]
        else:                                # identity (stride == 1 and cin == cout)
            skip = x

        # --- conv1 + bn1 + relu (stride-2 blocks subsample inside _conv3x3) ---
        y = jnp.maximum(
            _conv3x3(x, m, w, _CIN[c1], c1, w33_ref, s33_ref, b33_ref,
                     buf_ref, masks, pad, sub=sub), 0.0)

        if stride == 2:                      # resolution drops; rebuild the edge masks
            h, w, m = h // 2, w // 2, m // 4
            masks = _edge_masks(n, h, w)

        # --- conv2 + bn2 + skip + relu ---
        y = _conv3x3(y, m, w, _CIN[c2], c2, w33_ref, s33_ref, b33_ref,
                     buf_ref, masks, pad)
        x = jnp.maximum(y + skip, 0.0)

    o_ref[...] = x                           # (n*h0*w0/16, 128), lane-dense store


# ----------------------------------------------------------------------------
# pallas_call wrapper
# ----------------------------------------------------------------------------
def _const_spec(shape):
    nd = len(shape)
    return pl.BlockSpec(shape, lambda i, _nd=nd: (0,) * _nd)


def _backbone_pallas(xp, w33, s33, b33, w11, b11, sub2, sub3, *, n, h, w):
    m1 = n * h * w
    m3 = n * (h // 4) * (w // 4)
    pad = _round_up(w + 1, 8)                # shift-buffer halo, derived from the width
    kernel = functools.partial(_backbone_kernel, n=n, h0=h, w0=w, pad=pad)
    return pl.pallas_call(
        kernel,
        out_shape=jax.ShapeDtypeStruct((m3, CPAD), jnp.float32),
        grid_spec=pltpu.PrefetchScalarGridSpec(
            num_scalar_prefetch=0,
            # Whole batch in a single grid step (single-TC guidance): one weight DMA,
            # maximal M per MXU matmul, no per-step pipeline overhead.
            # TODO(synk): on dual-TC parts (v7x) a leading core-parallel axis splitting
            #             the batch would recover the second TensorCore.
            grid=(1,),
            in_specs=[
                _const_spec((m1, CPAD)),              # merged input image rows (f32)
                _const_spec((12, 2, CPAD, CPAD)),     # tap-packed 3x3 weights (bf16)
                _const_spec((12, 1, CPAD)),           # BN scale (f32)
                _const_spec((12, 1, CPAD)),           # BN shift + conv bias (f32)
                _const_spec((2, CPAD, CPAD)),         # 1x1 shortcut weights (bf16)
                _const_spec((2, 1, CPAD)),            # shortcut bias (f32)
                _const_spec(tuple(sub2.shape)),       # stride-2 selection, stage 2 (bf16)
                _const_spec(tuple(sub3.shape)),       # stride-2 selection, stage 3 (bf16)
            ],
            out_specs=_const_spec((m3, CPAD)),
            scratch_shapes=[pltpu.VMEM((m1 + 2 * pad, CPAD), jnp.float32)],
        ),
        compiler_params=pltpu.CompilerParams(
            dimension_semantics=("arbitrary",),
            vmem_limit_bytes=32 * 1024 * 1024,
        ),
    )(xp, w33, s33, b33, w11, b11, sub2, sub3)


@functools.partial(jax.jit, static_argnames=("n", "h", "w"))
def _forward(img_nchw, w33, s33, b33, w11, b11, sub2, sub3, *, n, h, w):
    cin = img_nchw.shape[1]
    x = jnp.transpose(img_nchw, (0, 2, 3, 1)).reshape(n * h * w, cin)    # NHWC, flattened
    xp = jnp.pad(x.astype(jnp.float32), ((0, 0), (0, CPAD - cin)))       # pad C -> 128
    out = _backbone_pallas(xp, w33, s33, b33, w11, b11, sub2, sub3, n=n, h=h, w=w)
    hf, wf = h // 4, w // 4
    out = out[:, :OUT_CH].reshape(n, hf, wf, OUT_CH)
    return jnp.transpose(out, (0, 3, 1, 2))                              # back to NCHW


def _downsample_matrices(n, h, w):
    """Host-precomputed stride-2 row-selection matrices for the merged-batch layout."""
    def sel(hh, ww):
        ho, wo = hh // 2, ww // 2
        mo, mi = n * ho * wo, n * hh * ww
        s = np.zeros((mo, mi), np.float32)
        for k in range(n):
            for i in range(ho):
                for j in range(wo):
                    s[k * ho * wo + i * wo + j, k * hh * ww + 2 * i * ww + 2 * j] = 1.0
        return jnp.asarray(s, jnp.bfloat16)          # 0/1 entries: bf16 is lossless
    return sel(h, w), sel(h // 2, w // 2)


def backbone_apply(img_nchw, packed_params):
    n, c, h, w = img_nchw.shape
    assert c == 3, "EasyBackboneNet expects 3 input channels"
    assert h % 4 == 0 and w % 4 == 0, "spatial dims must be divisible by 4"
    sub2, sub3 = _downsample_matrices(n, h, w)
    return _forward(img_nchw, *packed_params, sub2, sub3, n=n, h=h, w=w)


# ----------------------------------------------------------------------------
# Deterministic parameter construction (mirrors the module's __init__ shapes)
# ----------------------------------------------------------------------------
def make_residual_params(key, cin, cout, use_conv, stride):
    ks = jax.random.split(key, 14)

    def rnd(k, shape, s=0.1):
        return s * jax.random.normal(k, shape, jnp.float32)

    def rnd_w(k, shape, s=0.1):
        # Conv weights are stored as bf16 inside the packed kernel operands; generate
        # them bf16-representable so the bf16 storage is lossless w.r.t. the reference.
        return rnd(k, shape, s).astype(jnp.bfloat16).astype(jnp.float32)

    p = dict(
        stride=stride, use_conv=use_conv,
        w1=rnd_w(ks[0], (cout, cin, 3, 3)), b1=rnd(ks[1], (cout,)),
        w2=rnd_w(ks[2], (cout, cout, 3, 3)), b2=rnd(ks[3], (cout,)),
        g1=1.0 + rnd(ks[4], (cout,)), be1=rnd(ks[5], (cout,)),
        rm1=rnd(ks[6], (cout,)), rv1=1.0 + jnp.abs(rnd(ks[7], (cout,))),
        g2=1.0 + rnd(ks[8], (cout,)), be2=rnd(ks[9], (cout,)),
        rm2=rnd(ks[10], (cout,)), rv2=1.0 + jnp.abs(rnd(ks[11], (cout,))),
    )
    if use_conv:
        p["w3"], p["b3"] = rnd_w(ks[12], (cout, cin, 1, 1)), rnd(ks[13], (cout,))
    else:
        assert stride == 1 and cin == cout, "identity skip needs stride 1 and cin == cout"
    return p


def make_backbone_params(key):
    # (cin, cout, use_conv, stride) for b1 (first_block), b2, b3 -- 2 residuals each.
    specs = [
        (3, 3, False, 1), (3, 3, False, 1),
        (3, 12, True, 2), (12, 12, False, 1),
        (12, 21, True, 2), (21, 21, False, 1),
    ]
    keys = jax.random.split(key, len(specs))
    return [make_residual_params(k, *s) for k, s in zip(keys, specs)]


def pack_backbone_params(params):
    """Pack conv weights into tap-packed, lane-padded bf16 matrices + f32 BN scale/shift.

    w33[idx, g, tg*cin + ci, co] holds the 3x3 weight of tap tg (group g) so that a
    single matmul against the lane-packed im2col matrix computes the whole conv.
    """
    up = _roll_moves_lanes_up()
    w33 = np.zeros((12, 2, CPAD, CPAD), np.float32)
    s33 = np.zeros((12, 1, CPAD), np.float32)
    b33 = np.zeros((12, 1, CPAD), np.float32)
    w11 = np.zeros((2, CPAD, CPAD), np.float32)
    b11 = np.zeros((2, 1, CPAD), np.float32)
    sc = 0
    for bi, p in enumerate(params):
        for which in (1, 2):
            wgt = np.asarray(p[f"w{which}"])                       # (cout, cin, 3, 3)
            bia = np.asarray(p[f"b{which}"])
            gam = np.asarray(p[f"g{which}"]); bet = np.asarray(p[f"be{which}"])
            rm = np.asarray(p[f"rm{which}"]); rv = np.asarray(p[f"rv{which}"])
            scale = gam / np.sqrt(rv + EPS)                        # BN scale (f32, post-mul)
            shift = (bia - rm) * scale + bet                       # conv bias + BN shift
            cout, cin = wgt.shape[0], wgt.shape[1]
            wt = np.transpose(wgt, (2, 3, 1, 0))                   # (3, 3, cin, cout)
            idx = 2 * bi + (which - 1)
            tpg = _taps_per_group(cin)
            for t in range(9):
                dy, dx = t // 3, t % 3
                g, tg = (0, t) if t < tpg else (1, t - tpg)
                lane0 = (tg * cin) if up else (CPAD - tg * cin) % CPAD
                w33[idx, g, lane0:lane0 + cin, :cout] = wt[dy, dx]
            s33[idx, 0, :cout] = scale
            b33[idx, 0, :cout] = shift
        if p["use_conv"]:
            w3 = np.asarray(p["w3"])[:, :, 0, 0]                   # (cout, cin)
            cout, cin = w3.shape
            w11[sc, :cin, :cout] = w3.T
            b11[sc, 0, :cout] = np.asarray(p["b3"])
            sc += 1
    return (jnp.asarray(w33, jnp.bfloat16), jnp.asarray(s33), jnp.asarray(b33),
            jnp.asarray(w11, jnp.bfloat16), jnp.asarray(b11))


# ----------------------------------------------------------------------------
# Pure-JAX reference (lax.conv) for correctness checking
# ----------------------------------------------------------------------------
def _conv_ref(x, w, b, stride, pad):
    y = lax.conv_general_dilated(
        x, jnp.transpose(w, (2, 3, 1, 0)),
        window_strides=(stride, stride),
        padding=((pad, pad), (pad, pad)),
        dimension_numbers=("NHWC", "HWIO", "NHWC"))
    return y + b


def _bn_ref(x, g, be, rm, rv):
    return (x - rm) / jnp.sqrt(rv + EPS) * g + be


def _residual_ref(x, p):
    y = jax.nn.relu(_bn_ref(_conv_ref(x, p["w1"], p["b1"], p["stride"], 1),
                            p["g1"], p["be1"], p["rm1"], p["rv1"]))
    y = _bn_ref(_conv_ref(y, p["w2"], p["b2"], 1, 1),
                p["g2"], p["be2"], p["rm2"], p["rv2"])
    if p["use_conv"]:
        x = _conv_ref(x, p["w3"], p["b3"], p["stride"], 0)
    return jax.nn.relu(y + x)


def backbone_ref(img_nchw, params):
    x = jnp.transpose(img_nchw, (0, 2, 3, 1))
    for p in params:
        x = _residual_ref(x, p)
    return jnp.transpose(x, (0, 3, 1, 2))


if __name__ == "__main__":
    key = jax.random.PRNGKey(0)
    kp, kx = jax.random.split(key)
    params = make_backbone_params(kp)
    packed = pack_backbone_params(params)

    img = jax.random.normal(kx, (2, 3, 16, 16), jnp.float32)   # NCHW, like the PyTorch module

    out = backbone_apply(img, packed)
    out = jax.block_until_ready(out)
    assert out.shape == (2, 21, 4, 4), out.shape               # 16 -> 16 (b1) -> 8 (b2) -> 4 (b3)

    ref = backbone_ref(img, params)
    np.testing.assert_allclose(np.asarray(out), np.asarray(ref), rtol=2e-3, atol=2e-3)

    print("KERNEL_OK")
</pallas_src>

<mosaic_0001>
module attributes {stable_mosaic.version = 11 : i64} {
  func.func @k(%arg0: memref<8x128xf32, #tpu.memory_space<vmem>>, %arg1: memref<8x128xf32, #tpu.memory_space<vmem>>) attributes {dimension_semantics = [], scalar_prefetch = 0 : i64, scratch_operands = 0 : i64, tpu.core_type = #tpu.core_type<tc>} {
    %c0 = arith.constant 0 : index
    %c0_0 = arith.constant 0 : index
    %0 = vector.load %arg0[%c0, %c0_0] : memref<8x128xf32, #tpu.memory_space<vmem>>, vector<8x128xf32>
    %c1_i32 = arith.constant 1 : i32
    %1 = tpu.dynamic_rotate %0 by %c1_i32 dim 1 : vector<8x128xf32>, i32 -> vector<8x128xf32>
    %c0_1 = arith.constant 0 : index
    %c0_2 = arith.constant 0 : index
    %2 = vector.load %arg1[%c0_1, %c0_2] : memref<8x128xf32, #tpu.memory_space<vmem>>, vector<8x128xf32>
    tpu.vector_store %arg1[%c0_1, %c0_2], %1 {strides = array<i32>} : memref<8x128xf32, #tpu.memory_space<vmem>>, vector<8x128xf32>,
    return
  }
}

</mosaic_0001>

<bundles_post_ra>
// kernel: tpu_custom_call.1
= control target key start
LH: loop header
LB: loop body
LE: loop exit
PB: predicated region body
PF: predicated region fallthrough
CT: control target
= control target key end

     0   :  { %6 = vsyncpa [#allocation3], 0  ;;  %s128_s0 = inlined_call_operand.hbm [shape: f32[8,128], index: 0, kind: input, shape index: {}]   ;;  %s129_s1 = inlined_call_operand.hbm [shape: f32[8,128], index: 1, kind: output, shape index: {}]  }
   0x1   :  { %7 = vsyncpa [#allocation4], 0  ;;  %s91_s6 = smov [#allocation2]   ;;  %s43_s10 = scalar_lea.hbm %s128_s0, 128 }
   0x2   :  { %s14_s7 = sshll.u32 %s91_s6, 4  ;;  %p44_p0 = scmp.ne.s32.totalorder %s128_s0, %s43_s10  ;;  %s15_s7 = int_to_ptr.vmem [resolvable:$true] %s14_s7 }
   0x3   :  { %p47_p1 = scmp.lt.u32.totalorder %s43_s10, %s128_s0 }
   0x5   :  { %p49_p2 = pnand %p47_p1, %p44_p0 }
   0x7   :  { %52 = shalt.err (!%p49_p2)
}
   0x8   :  { %s53_s15 = scalar_lea.vmem %s15_s7, 128  ;;  %p58_p4 = scmp.lt.s32.totalorder %s15_s7, %s15_s7 }
   0x9   :  { %p54_p3 = scmp.ne.s32.totalorder %s15_s7, %s53_s15  ;;  %p59_p5 = scmp.lt.s32.totalorder %s53_s15, %s53_s15 }
   0xb   :  { %p60_p6 = por %p59_p5, %p58_p4 }
   0xd   :  { %p61_p7 = pnand %p60_p6, %p54_p3 }
   0xf   :  { %64 = shalt.err (!%p61_p7)
}
  0x10   :  { %17 = dma.hbm_to_vmem [thread:$0]  %s128_s0, 128, %s15_s7, [#allocation3]  }
  0x11   :  { %87 = dma.done.wait [#allocation3], 128  }
  0x12   :  { %88 = vsyncadd [#allocation3], 4294967168  ;;  %v21_v0 = vld [vmem:[#allocation2] sm:$0xff]  ;;  %s92_s18 = smov 1   ;;  %s93_s19 = smov [#allocation5]  }
  0x13   :  { %22 = vrot.lane.b32.xlu0 %v21_v0, %s92_s18  ;;  %s31_s20 = sshll.u32 %s93_s19, 4  ;;  %s32_s20 = int_to_ptr.vmem [resolvable:$true] %s31_s20 }
  0x14   :  { %s65_s21 = scalar_lea.vmem %s32_s20, 128  ;;  %p70_p9 = scmp.lt.s32.totalorder %s32_s20, %s32_s20 }
  0x15   :  { %p66_p8 = scmp.ne.s32.totalorder %s32_s20, %s65_s21  ;;  %p71_p10 = scmp.lt.s32.totalorder %s65_s21, %s65_s21 }
  0x17   :  { %p72_p11 = por %p71_p10, %p70_p9 }
  0x19   :  { %p73_p12 = pnand %p72_p11, %p66_p8 }
  0x85   :  { %v23_v1 = vpop.permute.xlu0 %22 }
  0x86   :  { %24 = vst [vmem:[#allocation5] sm:$0xff] %v23_v1 }
  0x87   :  { %76 = shalt.err (!%p73_p12)
}
  0x88   :  { %s77_s0 = scalar_lea.hbm %s129_s1, 128 }
  0x89   :  { %p78_p13 = scmp.ne.s32.totalorder %s129_s1, %s77_s0  ;;  %p81_p0 = scmp.lt.u32.totalorder %s77_s0, %s129_s1 }
  0x8b   :  { %p83_p1 = pnand %p81_p0, %p78_p13 }
  0x8d   :  { %86 = shalt.err (!%p83_p1)
}
  0x8e   :  { %34 = dma.vmem_to_hbm [thread:$0]  %s32_s20, 128, %s129_s1, [#allocation4]  }
  0x8f   :  { %89 = dma.done.wait [#allocation4], 128  }
  0x90   :  { %90 = vsyncadd [#allocation4], 4294967168 }
  0x91   :  { %38 = vsyncpa [#allocation3], 1 }
  0x92   :  { %39 = vsyncpa [#allocation4], 1 }

</bundles_post_ra>
